<compile_context>
chip_gen: v7x
topology: tpu7x:2x2x1
jax: 0.10.0
libtpu: 0.0.40
codegen_flags: <defaults>
</compile_context>

<pallas_src>
import functools

import jax
import jax.numpy as jnp
from jax import lax
from jax.experimental import pallas as pl
from jax.experimental.pallas import tpu as pltpu


_BLOCK_TARGET_BYTES = 6 * 1024 * 1024    # ~6 MiB per input block per grid step
_BLOCK_MAX_BYTES = 8 * 1024 * 1024       # never exceed 8 MiB per input block
_CHUNK_TARGET_BYTES = 128 * 1024         # per-operand sub-chunk (vreg pressure)
_VMEM_LIMIT_CAP = 48 * 1024 * 1024       # safe on v7x's 64 MiB per-core VMEM
_VMEM_LIMIT_FLOOR = 16 * 1024 * 1024
_VMEM_HEADROOM = 8 * 1024 * 1024


def _cdiv(a: int, b: int) -> int:
    return -(-a // b)


def _round_up(a: int, m: int) -> int:
    return _cdiv(a, m) * m


def _num_tensorcores() -> int:
    """Best-effort TensorCores-per-chip (2 on v7x, 1 on v5e/v6e); default 1."""
    try:
        dev = jax.devices()[0]
        for attr in ("num_cores", "core_count"):
            v = getattr(dev, attr, None)
            if isinstance(v, int) and v >= 1:
                return min(v, 2)
    except Exception:
        pass
    try:
        info = pltpu.get_tpu_info()
        for attr in ("num_cores", "core_count", "tensorcores_per_chip"):
            v = getattr(info, attr, None)
            if isinstance(v, int) and v >= 1:
                return min(v, 2)
    except Exception:
        pass
    return 1


def _emit_row_cases(blk, full_blocks, tail_rows, has_phantom, do_full, do_tail):
    """Run do_full() on full row tiles, do_tail() on the single ragged tail
    tile, nothing on phantom tiles; guards only emitted when actually needed."""
    if full_blocks > 0:
        if tail_rows > 0 or has_phantom:
            pl.when(blk < full_blocks)(do_full)
        else:
            do_full()
    if tail_rows > 0:
        if full_blocks > 0 or has_phantom:
            pl.when(blk == full_blocks)(do_tail)
        else:
            do_tail()


def _dice_kernel(pred_ref, tgt_ref, out_ref, acc_ref, *col_scratch,
                 steps, full_blocks, tail_rows, has_phantom,
                 c_steps, last_cols, row_chunk, col_chunk, unroll):
    s = pl.program_id(0)                   # parallel split (a TensorCore on v7x)
    i = pl.program_id(1)                   # sequential row-tile step
    n_i = pl.num_programs(1)
    blk = s * steps + i                    # global (unclamped) row-block index
    tb, tc = pred_ref.shape

    if c_steps == 1:
        # ---------------- whole reduction axis in one block ----------------
        @pl.when(i == 0)
        def _init():
            acc_ref[...] = jnp.zeros_like(acc_ref)

        def chunk_sum(r0, valid_in_chunk):
            # Upcast is a no-op for f32; lets callers feed bf16 to halve HBM reads.
            p = pred_ref[pl.ds(r0, row_chunk), :].astype(jnp.float32)
            t = tgt_ref[pl.ds(r0, row_chunk), :].astype(jnp.float32)
            num = 2.0 * jnp.sum(p * t, axis=1, keepdims=True) + 1.0
            den = jnp.sum(p + t, axis=1, keepdims=True) + 1.0
            coe = num / den                                    # (row_chunk, 1)
            if valid_in_chunk != row_chunk:
                # Ragged tail chunk only: keep the SELECT form so garbage rows
                # (den may be 0 / NaN) are discarded, never propagated.
                local = lax.broadcasted_iota(jnp.int32, coe.shape, 0)
                coe = jnp.where(local < valid_in_chunk, coe, 0.0)
            return jnp.sum(coe)

        def tile_sum(valid_rows):
            n_full = valid_rows // row_chunk
            rem = valid_rows - n_full * row_chunk
            total = jnp.float32(0.0)
            if n_full == 1:
                total = total + chunk_sum(0, row_chunk)
            elif n_full > 1:
                total = total + lax.fori_loop(
                    0, n_full,
                    lambda ci, acc: acc + chunk_sum(
                        pl.multiple_of(ci * row_chunk, row_chunk), row_chunk),
                    jnp.float32(0.0), unroll=unroll)
            if rem:
                total = total + chunk_sum(n_full * row_chunk, rem)
            return total

        def do_full():
            acc_ref[...] += tile_sum(tb)

        def do_tail():
            acc_ref[...] += tile_sum(tail_rows)

        _emit_row_cases(blk, full_blocks, tail_rows, has_phantom, do_full, do_tail)

        @pl.when(i == n_i - 1)
        def _store():
            out_ref[...] = acc_ref[...]
    else:
        # ------------- reduction axis tiled (very large C) -------------
        num_ref, den_ref = col_scratch
        k = pl.program_id(2)
        n_k = pl.num_programs(2)

        @pl.when(jnp.logical_and(i == 0, k == 0))
        def _init_acc():
            acc_ref[...] = jnp.zeros_like(acc_ref)

        @pl.when(k == 0)
        def _init_rows():
            num_ref[...] = jnp.zeros_like(num_ref)
            den_ref[...] = jnp.zeros_like(den_ref)

        def accum_cols(width):
            num_p = jnp.zeros(num_ref.shape, jnp.float32)
            den_p = jnp.zeros(den_ref.shape, jnp.float32)
            for c0 in range(0, width, col_chunk):             # static loop
                load_w = min(col_chunk, tc - c0)              # multiple of 128
                valid = min(load_w, width - c0)
                p = pred_ref[:, pl.ds(c0, load_w)].astype(jnp.float32)
                t = tgt_ref[:, pl.ds(c0, load_w)].astype(jnp.float32)
                if valid != load_w:
                    # Ragged final column chunk only: zero padded lanes before
                    # they ever enter the math (NaN-safe select form).
                    lane = lax.broadcasted_iota(jnp.int32, p.shape, 1)
                    keep = lane < valid
                    p = jnp.where(keep, p, 0.0)
                    t = jnp.where(keep, t, 0.0)
                num_p = num_p + jnp.sum(p * t, axis=1, keepdims=True)
                den_p = den_p + jnp.sum(p + t, axis=1, keepdims=True)
            num_ref[...] += num_p
            den_ref[...] += den_p

        if last_cols == tc:
            accum_cols(tc)
        else:
            pl.when(k < n_k - 1)(lambda: accum_cols(tc))
            pl.when(k == n_k - 1)(lambda: accum_cols(last_cols))

        def finish(valid_rows):
            num = 2.0 * num_ref[...] + 1.0
            den = den_ref[...] + 1.0
            coe = num / den                                    # (tb, 1), tb small
            if valid_rows != tb:
                local = lax.broadcasted_iota(jnp.int32, coe.shape, 0)
                coe = jnp.where(local < valid_rows, coe, 0.0)
            return jnp.sum(coe)

        @pl.when(k == n_k - 1)
        def _finish_rows():
            def do_full():
                acc_ref[...] += finish(tb)

            def do_tail():
                acc_ref[...] += finish(tail_rows)

            _emit_row_cases(blk, full_blocks, tail_rows, has_phantom,
                            do_full, do_tail)

        @pl.when(jnp.logical_and(i == n_i - 1, k == n_k - 1))
        def _store():
            out_ref[...] = acc_ref[...]


def dice_coefficient(pred: jax.Array, targets: jax.Array, *,
                     tb: int | None = None, tc: int | None = None,
                     n_split: int | None = None,
                     row_chunk: int | None = None) -> jax.Array:
    """Pallas TPU implementation of DiceCoefficient.forward for 2-D (B, C)."""
    assert pred.shape == targets.shape and pred.ndim == 2, (pred.shape, targets.shape)
    B, C = pred.shape
    itemsize = jnp.dtype(pred.dtype).itemsize
    padded_row_bytes = _round_up(C, 128) * itemsize   # VMEM footprint of one row

    # ---- column (reduction-axis) tile: only split C when even a minimal
    #      8-row block would blow the per-block byte budget (very large C). ----
    if tc is None:
        if 8 * padded_row_bytes <= _BLOCK_MAX_BYTES:
            tc = C
        else:
            tc = max(128, (_BLOCK_TARGET_BYTES // (8 * itemsize)) // 128 * 128)
            tc = min(tc, _round_up(C, 128))
    if tc >= C:
        tc, c_steps, last_cols = C, 1, C
    else:
        assert tc % 128 == 0, "column tile must be a multiple of 128"
        c_steps = _cdiv(C, tc)
        last_cols = C - (c_steps - 1) * tc

    # ---- row tile: sized by bytes so the per-step overhead is amortised ----
    if tb is None:
        if c_steps == 1:
            tb = max(8, (_BLOCK_TARGET_BYTES // padded_row_bytes) // 8 * 8)
        else:
            tb = 8            # per-row num/den persist across C steps
    tb = max(8, (tb // 8) * 8)
    tb = min(tb, _round_up(B, 8))

    # ---- sub-chunk sizes (bound vreg live ranges inside a tile) ----
    if row_chunk is None:
        row_chunk = (_CHUNK_TARGET_BYTES // padded_row_bytes) // 8 * 8
    row_chunk = max(8, min(tb, (row_chunk // 8) * 8))
    tb = max(row_chunk, (tb // row_chunk) * row_chunk)
    col_chunk = max(128, min(tc, (_CHUNK_TARGET_BYTES // (tb * itemsize)) // 128 * 128))

    # ---- grid: (split, row tiles, C tiles); reduction axis last ----
    full_blocks, tail_rows = B // tb, B % tb
    num_blocks = full_blocks + (1 if tail_rows else 0)
    if n_split is None:
        n_split = _num_tensorcores()     # 2 on dual-TC chips (v7x), else 1
    n_split = max(1, min(n_split, num_blocks))
    steps = _cdiv(num_blocks, n_split)
    has_phantom = n_split * steps > num_blocks
    last_blk = num_blocks - 1

    if has_phantom:
        # Clamp phantom blocks onto the last real block: always in-bounds, and
        # since the block index repeats, the pipeline skips the re-fetch.
        def row_blk(s, i):
            return jnp.minimum(s * steps + i, last_blk)
    else:
        def row_blk(s, i):
            return s * steps + i

    in_map = lambda s, i, k: (row_blk(s, i), k)
    out_map = lambda s, i, k: (s, 0)

    # ---- scoped VMEM: actual need + headroom, capped for v7x (64 MiB/core) ----
    block_bytes = tb * _round_up(tc, 128) * itemsize
    vmem_need = 4 * block_bytes + 3 * 8 * 128 * 4     # 2 in x 2 bufs + out/acc
    if c_steps > 1:
        vmem_need += 2 * tb * 128 * 4                 # lane-padded (tb,1) num/den
    vmem_limit = min(_VMEM_LIMIT_CAP, vmem_need + _VMEM_HEADROOM)
    vmem_limit = max(vmem_limit, vmem_need + 2 * 1024 * 1024, _VMEM_LIMIT_FLOOR)

    scratch = [pltpu.VMEM((8, 128), jnp.float32)]
    if c_steps > 1:
        scratch += [pltpu.VMEM((tb, 1), jnp.float32),
                    pltpu.VMEM((tb, 1), jnp.float32)]

    kernel = functools.partial(
        _dice_kernel,
        steps=steps, full_blocks=full_blocks, tail_rows=tail_rows,
        has_phantom=has_phantom, c_steps=c_steps, last_cols=last_cols,
        row_chunk=row_chunk, col_chunk=col_chunk,
        unroll=(tb // row_chunk) <= 8)

    out = pl.pallas_call(
        kernel,
        out_shape=jax.ShapeDtypeStruct((n_split * 8, 128), jnp.float32),
        grid_spec=pltpu.PrefetchScalarGridSpec(
            num_scalar_prefetch=0,
            grid=(n_split, steps, c_steps),
            in_specs=[pl.BlockSpec((tb, tc), in_map),
                      pl.BlockSpec((tb, tc), in_map)],
            out_specs=pl.BlockSpec((8, 128), out_map),
            scratch_shapes=scratch),
        compiler_params=pltpu.CompilerParams(
            dimension_semantics=("parallel", "arbitrary", "arbitrary"),
            vmem_limit_bytes=int(vmem_limit)),
    )(pred, targets)

    partials = out[::8, 0]                       # one partial sum per split
    return jnp.sum(partials) / jnp.float32(B)    # mean over the global batch


def _reference(pred, targets):
    num = 2.0 * jnp.sum(pred * targets, axis=1) + 1.0
    den = jnp.sum(pred + targets, axis=1) + 1.0
    return jnp.mean(num / den)


if __name__ == "__main__":
    key = jax.random.PRNGKey(0)

    # Primary check: shapes implied by the module (per-row scores + binary mask).
    k1, k2 = jax.random.split(key)
    B, C = 16, 128
    pred = jax.nn.sigmoid(jax.random.normal(k1, (B, C), dtype=jnp.float32))
    targets = (jax.random.uniform(k2, (B, C)) > 0.5).astype(jnp.float32)
    out = jax.block_until_ready(dice_coefficient(pred, targets))
    ref = _reference(pred, targets)
    assert jnp.allclose(out, ref, rtol=1e-5, atol=1e-5), (out, ref)

    # Ragged batch + 2-way split (phantom block) + multi-chunk row loop.
    k3, k4 = jax.random.split(k2)
    pred2 = jax.nn.sigmoid(jax.random.normal(k3, (37, 128), dtype=jnp.float32))
    targets2 = (jax.random.uniform(k4, (37, 128)) > 0.5).astype(jnp.float32)
    out2 = jax.block_until_ready(
        dice_coefficient(pred2, targets2, tb=16, row_chunk=8, n_split=2))
    ref2 = _reference(pred2, targets2)
    assert jnp.allclose(out2, ref2, rtol=1e-5, atol=1e-5), (out2, ref2)

    # Reduction-axis (C) tiling path with a ragged last column block.
    k5, k6 = jax.random.split(k4)
    pred3 = jax.nn.sigmoid(jax.random.normal(k5, (21, 1000), dtype=jnp.float32))
    targets3 = (jax.random.uniform(k6, (21, 1000)) > 0.5).astype(jnp.float32)
    out3 = jax.block_until_ready(
        dice_coefficient(pred3, targets3, tc=256, n_split=2))
    ref3 = _reference(pred3, targets3)
    assert jnp.allclose(out3, ref3, rtol=1e-5, atol=1e-5), (out3, ref3)

    print("KERNEL_OK")
</pallas_src>

<mosaic_0001>
module attributes {stable_mosaic.version = 11 : i64} {
  func.func @_dice_kernel(%arg0: i32, %arg1: i32, %arg2: i32, %arg3: memref<16x128xf32, #tpu.memory_space<vmem>>, %arg4: memref<16x128xf32, #tpu.memory_space<vmem>>, %arg5: memref<8x128xf32, #tpu.memory_space<vmem>>, %arg6: memref<8x128xf32, #tpu.memory_space<vmem>>) attributes {dimension_semantics = [#tpu.dimension_semantics<parallel>, #tpu.dimension_semantics<arbitrary>, #tpu.dimension_semantics<arbitrary>], iteration_bounds = array<i64: 1, 1, 1>, scalar_prefetch = 0 : i64, scratch_operands = 1 : i64, tpu.core_type = #tpu.core_type<tc>, window_params = [{transform_indices = @transform_0, window_bounds = array<i64: 16, 128>}, {transform_indices = @transform_1, window_bounds = array<i64: 16, 128>}, {transform_indices = @transform_2, window_bounds = array<i64: 8, 128>}]} {
    %c0_i32 = arith.constant 0 : i32
    %0 = arith.cmpi eq, %arg1, %c0_i32 : i32
    %1 = arith.extui %0 : i1 to i32
    %c0_i32_0 = arith.constant 0 : i32
    %2 = arith.cmpi ne, %1, %c0_i32_0 : i32
    scf.if %2 {
      %cst_16 = arith.constant 0.000000e+00 : f32
      %30 = vector.broadcast %cst_16 : f32 to vector<8x128xf32>
      %c0_17 = arith.constant 0 : index
      %c0_18 = arith.constant 0 : index
      %31 = vector.load %arg6[%c0_17, %c0_18] : memref<8x128xf32, #tpu.memory_space<vmem>>, vector<8x128xf32>
      tpu.vector_store %arg6[%c0_17, %c0_18], %30 {strides = array<i32>} : memref<8x128xf32, #tpu.memory_space<vmem>>, vector<8x128xf32>,
    } else {
    }
    %c0 = arith.constant 0 : index
    %c0_1 = arith.constant 0 : index
    %3 = vector.load %arg6[%c0, %c0_1] : memref<8x128xf32, #tpu.memory_space<vmem>>, vector<8x128xf32>
    %c0_2 = arith.constant 0 : index
    %c0_3 = arith.constant 0 : index
    %4 = vector.load %arg3[%c0_2, %c0_3] : memref<16x128xf32, #tpu.memory_space<vmem>>, vector<16x128xf32>
    %c0_4 = arith.constant 0 : index
    %c0_5 = arith.constant 0 : index
    %5 = vector.load %arg4[%c0_4, %c0_5] : memref<16x128xf32, #tpu.memory_space<vmem>>, vector<16x128xf32>
    %6 = arith.mulf %4, %5 : vector<16x128xf32>
    %cst = arith.constant dense<0.000000e+00> : vector<16xf32>
    %7 = vector.multi_reduction <add>, %6, %cst [1] : vector<16x128xf32> to vector<16xf32>
    %8 = vector.shape_cast %7 : vector<16xf32> to vector<16x1xf32>
    %cst_6 = arith.constant 2.000000e+00 : f32
    %9 = vector.broadcast %cst_6 : f32 to vector<16x1xf32>
    %10 = arith.mulf %9, %8 : vector<16x1xf32>
    %cst_7 = arith.constant 1.000000e+00 : f32
    %11 = vector.broadcast %cst_7 : f32 to vector<16x1xf32>
    %12 = arith.addf %10, %11 : vector<16x1xf32>
    %13 = arith.addf %4, %5 : vector<16x128xf32>
    %cst_8 = arith.constant dense<0.000000e+00> : vector<16xf32>
    %14 = vector.multi_reduction <add>, %13, %cst_8 [1] : vector<16x128xf32> to vector<16xf32>
    %15 = vector.shape_cast %14 : vector<16xf32> to vector<16x1xf32>
    %cst_9 = arith.constant 1.000000e+00 : f32
    %16 = vector.broadcast %cst_9 : f32 to vector<16x1xf32>
    %17 = arith.addf %15, %16 : vector<16x1xf32>
    %18 = arith.divf %12, %17 : vector<16x1xf32>
    %19 = vector.shape_cast %18 : vector<16x1xf32> to vector<1x16x1xf32>
    %cst_10 = arith.constant dense<0.000000e+00> : vector<1xf32>
    %20 = vector.multi_reduction <add>, %19, %cst_10 [1, 2] : vector<1x16x1xf32> to vector<1xf32>
    %21 = vector.shape_cast %20 : vector<1xf32> to vector<1x1x1xf32>
    %22 = vector.extract %21[0, 0, 0] : f32 from vector<1x1x1xf32>
    %cst_11 = arith.constant 0.000000e+00 : f32
    %23 = arith.addf %cst_11, %22 : f32
    %24 = vector.broadcast %23 : f32 to vector<8x128xf32>
    %25 = arith.addf %3, %24 : vector<8x128xf32>
    %c0_12 = arith.constant 0 : index
    %c0_13 = arith.constant 0 : index
    %26 = vector.load %arg6[%c0_12, %c0_13] : memref<8x128xf32, #tpu.memory_space<vmem>>, vector<8x128xf32>
    tpu.vector_store %arg6[%c0_12, %c0_13], %25 {strides = array<i32>} : memref<8x128xf32, #tpu.memory_space<vmem>>, vector<8x128xf32>,
    %c0_i32_14 = arith.constant 0 : i32
    %27 = arith.cmpi eq, %arg1, %c0_i32_14 : i32
    %28 = arith.extui %27 : i1 to i32
    %c0_i32_15 = arith.constant 0 : i32
    %29 = arith.cmpi ne, %28, %c0_i32_15 : i32
    scf.if %29 {
      %c0_16 = arith.constant 0 : index
      %c0_17 = arith.constant 0 : index
      %30 = vector.load %arg6[%c0_16, %c0_17] : memref<8x128xf32, #tpu.memory_space<vmem>>, vector<8x128xf32>
      %c0_18 = arith.constant 0 : index
      %c0_19 = arith.constant 0 : index
      %31 = vector.load %arg5[%c0_18, %c0_19] : memref<8x128xf32, #tpu.memory_space<vmem>>, vector<8x128xf32>
      tpu.vector_store %arg5[%c0_18, %c0_19], %30 {strides = array<i32>} : memref<8x128xf32, #tpu.memory_space<vmem>>, vector<8x128xf32>,
    } else {
    }
    return
  }
  func.func @transform_0(%arg0: i32, %arg1: i32, %arg2: i32) -> (i32, i32) {
    %c1_i32 = arith.constant 1 : i32
    %0 = arith.muli %arg0, %c1_i32 : i32
    %1 = arith.addi %0, %arg1 : i32
    %c0_i32 = arith.constant 0 : i32
    return %1, %arg2 : i32, i32
  }
  func.func @transform_1(%arg0: i32, %arg1: i32, %arg2: i32) -> (i32, i32) {
    %c1_i32 = arith.constant 1 : i32
    %0 = arith.muli %arg0, %c1_i32 : i32
    %1 = arith.addi %0, %arg1 : i32
    %c0_i32 = arith.constant 0 : i32
    return %1, %arg2 : i32, i32
  }
  func.func @transform_2(%arg0: i32, %arg1: i32, %arg2: i32) -> (i32, i32) {
    %c0_i32 = arith.constant 0 : i32
    %c0_i32_0 = arith.constant 0 : i32
    return %arg0, %c0_i32 : i32, i32
  }
}

</mosaic_0001>

<bundles_post_ra>
// kernel: tpu_custom_call.1
= control target key start
LH: loop header
LB: loop body
LE: loop exit
PB: predicated region body
PF: predicated region fallthrough
CT: control target
= control target key end

     0   :  { %7 = vsyncpa [#allocation4], 0  ;;  %s261_s0 = inlined_call_operand.hbm [shape: f32[16,128], index: 0, kind: input, shape index: {}]   ;;  %s262_s1 = inlined_call_operand.hbm [shape: f32[16,128], index: 1, kind: input, shape index: {}]   ;;  %s263_s2 = inlined_call_operand.hbm [shape: f32[8,128], index: 2, kind: output, shape index: {}]  }
   0x1   :  { %8 = vsyncpa [#allocation7], 0 }
   0x2   :  { %9 = vsyncpa [#allocation5], 0  ;;  %s205_s9 = smov [#allocation3]   ;;  %s133_s13 = scalar_lea.hbm %s261_s0, 256 }
   0x3   :  { %s19_s10 = sshll.u32 %s205_s9, 4  ;;  %p134_p0 = scmp.ne.s32.totalorder %s261_s0, %s133_s13  ;;  %s20_s10 = int_to_ptr.vmem [resolvable:$true] %s19_s10 }
   0x4   :  { %p137_p1 = scmp.lt.u32.totalorder %s133_s13, %s261_s0 }
   0x6   :  { %p139_p2 = pnand %p137_p1, %p134_p0 }
   0x8   :  { %142 = shalt.err (!%p139_p2)
}
   0x9   :  { %s143_s18 = scalar_lea.vmem %s20_s10, 256  ;;  %p148_p4 = scmp.lt.s32.totalorder %s20_s10, %s20_s10 }
   0xa   :  { %p144_p3 = scmp.ne.s32.totalorder %s20_s10, %s143_s18  ;;  %p149_p5 = scmp.lt.s32.totalorder %s143_s18, %s143_s18 }
   0xc   :  { %p150_p6 = por %p149_p5, %p148_p4 }
   0xe   :  { %p151_p7 = pnand %p150_p6, %p144_p3 }
  0x10   :  { %154 = shalt.err (!%p151_p7)
}
  0x11   :  { %s206_s19 = smov 128   ;;  %s207_s20 = smov 8  }
  0x12   :  { %25 = dma.hbm_to_vmem [thread:$0]  %s261_s0, 256, %s20_s10, [#allocation4], %s206_s19, %s206_s19, %s207_s20  }
  0x13   :  { %s208_s23 = smov [#allocation6]   ;;  %s155_s27 = scalar_lea.hbm %s262_s1, 256 }
  0x14   :  { %s35_s24 = sshll.u32 %s208_s23, 4  ;;  %p156_p8 = scmp.ne.s32.totalorder %s262_s1, %s155_s27  ;;  %s36_s24 = int_to_ptr.vmem [resolvable:$true] %s35_s24 }
  0x15   :  { %p159_p9 = scmp.lt.u32.totalorder %s155_s27, %s262_s1 }
  0x17   :  { %p161_p10 = pnand %p159_p9, %p156_p8 }
  0x19   :  { %164 = shalt.err (!%p161_p10)
}
  0x1a   :  { %s165_s4 = scalar_lea.vmem %s36_s24, 256  ;;  %p170_p12 = scmp.lt.s32.totalorder %s36_s24, %s36_s24 }
  0x1b   :  { %p166_p11 = scmp.ne.s32.totalorder %s36_s24, %s165_s4  ;;  %p171_p13 = scmp.lt.s32.totalorder %s165_s4, %s165_s4 }
  0x1d   :  { %p172_p0 = por %p171_p13, %p170_p12 }
  0x1f   :  { %p173_p1 = pnand %p172_p0, %p166_p11 }
  0x21   :  { %176 = shalt.err (!%p173_p1)
}
  0x22   :  { %41 = dma.hbm_to_vmem [thread:$0]  %s262_s1, 256, %s36_s24, [#allocation7], %s206_s19, %s206_s19, %s207_s20  }
  0x23   :  { %199 = dma.done.wait [#allocation4], 256  }
  0x24   :  { %200 = vsyncadd [#allocation4], 4294967040 }
  0x25   :  { %201 = dma.done.wait [#allocation7], 256  }
  0x26   :  { %202 = vsyncadd [#allocation7], 4294967040  ;;  %v58_v0 = vld [vmem:[#allocation3] sm:$0xff]  ;;  %v60_v1 = vld [vmem:[#allocation6] sm:$0xff]  ;;  %vm84_vm0 = vcmask 7168   ;;  %s209_s1 = smov [#allocation8]  }
  0x27   :  { %v59_v2 = vld [vmem:[#allocation3 + $0x8] sm:$0xff]  ;;  %v72_v3 = vadd.f32 %v60_v1, %v58_v0  ;;  %v61_v4 = vld [vmem:[#allocation6 + $0x8] sm:$0xff]  ;;  %v62_v5 = vmul.f32 %v60_v1, %v58_v0  ;;  %s112_s6 = sshll.u32 %s209_s1, 4  ;;  %s113_s6 = int_to_ptr.vmem [resolvable:$true] %s112_s6 }
  0x28   :  { %v73_v6 = vadd.f32 %v61_v4, %v59_v2  ;;  %v63_v7 = vmul.f32 %v61_v4, %v59_v2  ;;  %s177_s8 = scalar_lea.vmem %s113_s6, 128  ;;  %p182_p3 = scmp.lt.s32.totalorder %s113_s6, %s113_s6 }
  0x29   :  { %74 = vadd.xlane.f32.xlu0 %v72_v3  ;;  %64 = vadd.xlane.f32.xlu1 %v62_v5  ;;  %p178_p2 = scmp.ne.s32.totalorder %s113_s6, %s177_s8  ;;  %p183_p4 = scmp.lt.s32.totalorder %s177_s8, %s177_s8 }
  0x2b   :  { %p184_p5 = por %p183_p4, %p182_p3 }
  0x2d   :  { %76 = vadd.xlane.f32.xlu0 %v73_v6  ;;  %66 = vadd.xlane.f32.xlu1 %v63_v7  ;;  %p185_p6 = pnand %p184_p5, %p178_p2 }
  0xb6   :  { %v75_v8 = vpop.xlane.xlu0 %74  ;;  %v65_v10 = vpop.xlane.xlu1 %64 }
  0xb7   :  { %v78_v9 = vadd.f32 1.0, %v75_v8  ;;  %v68_v14 = vmul.f32 2.0, %v65_v10 }
  0xb9   :  { %129 = vrcp.f32 %v78_v9  ;;  %v70_v16 = vadd.f32 1.0, %v68_v14 }
  0xba   :  { %v77_v11 = vpop.xlane.xlu0 %76  ;;  %v67_v13 = vpop.xlane.xlu1 %66 }
  0xbb   :  { %v79_v12 = vadd.f32 1.0, %v77_v11  ;;  %v69_v15 = vmul.f32 2.0, %v67_v13 }
  0xbd   :  { %131 = vrcp.f32 %v79_v12  ;;  %v71_v18 = vadd.f32 1.0, %v69_v15 }
  0xc3   :  { %v130_v17 = vpop.eup %129 }
  0xc4   :  { %v81_v19 = vmul.f32 %v130_v17, %v70_v16 }
  0xc6   :  { %v85_v22 = vsel %vm84_vm0, %v81_v19, 0.0 }
  0xc7   :  { %v132_v20 = vpop.eup %131 }
  0xc8   :  { %v83_v21 = vmul.f32 %v132_v20, %v71_v18 }
  0xca   :  { %v86_v23 = vsel %vm84_vm0, %v83_v21, 0.0 }
  0xcb   :  { %v87_v24 = vadd.f32 %v86_v23, %v85_v22 }
  0xcd   :  { %88 = vadd.xlane.f32.xlu0 %v87_v24 }
 0x15a   :  { %v89_v25 = vpop.xlane.xlu0 %88 }
 0x15b   :  { %v90_v26 = vrot.slane %v89_v25, 4 }
 0x15d   :  { %v91_v27 = vadd.f32 %v90_v26, %v89_v25 }
 0x15f   :  { %v92_v28 = vrot.slane %v91_v27, 2 }
 0x161   :  { %v93_v29 = vadd.f32 %v92_v28, %v91_v27 }
 0x163   :  { %v94_v30 = vrot.slane %v93_v29, 1 }
 0x165   :  { %v95_v31 = vadd.f32 %v94_v30, %v93_v29 }
 0x167   :  { %122 = vpush %v95_v31 }
 0x198   :  { %s123_s7 = spop %122 }
 0x199   :  { %v98_v32 = vstv %s123_s7 }
 0x19a   :  { %105 = vst [vmem:[#allocation8] sm:$0xff] %v98_v32 }
 0x19b   :  { %188 = shalt.err (!%p185_p6)
}
 0x19c   :  { %s189_s11 = scalar_lea.hbm %s263_s2, 128 }
 0x19d   :  { %p190_p7 = scmp.ne.s32.totalorder %s263_s2, %s189_s11  ;;  %p193_p8 = scmp.lt.u32.totalorder %s189_s11, %s263_s2 }
 0x19f   :  { %p195_p9 = pnand %p193_p8, %p190_p7 }
 0x1a1   :  { %198 = shalt.err (!%p195_p9)
}
 0x1a2   :  { %115 = dma.vmem_to_hbm [thread:$0]  %s113_s6, 128, %s263_s2, [#allocation5]  }
 0x1a3   :  { %203 = dma.done.wait [#allocation5], 128  }
 0x1a4   :  { %204 = vsyncadd [#allocation5], 4294967168 }
 0x1a5   :  { %119 = vsyncpa [#allocation4], 1 }
 0x1a6   :  { %120 = vsyncpa [#allocation7], 1 }
 0x1a7   :  { %121 = vsyncpa [#allocation5], 1 }

</bundles_post_ra>
